<compile_context>
chip_gen: v7x
topology: tpu7x:2x2x1
jax: 0.10.0
libtpu: 0.0.40
codegen_flags: <defaults>
</compile_context>

<pallas_src>
import jax
import jax.numpy as jnp
from jax.experimental import pallas as pl
from jax.experimental.pallas import tpu as pltpu


def make_divisible(v, divisor: int = 8, min_value: int = None):
    min_value = min_value or divisor
    new_v = max(min_value, int(v + divisor / 2) // divisor * divisor)
    if new_v < 0.9 * v:
        new_v += divisor
    return new_v


def _se_kernel(x_ref, w1_ref, b1_ref, w2_ref, b2_ref, o_ref):
    # x_ref: (GB, C, HW) in the caller's native dtype; channels on sublanes,
    # spatial (HW) on lanes.
    x = x_ref[...]                                               # (GB, C, HW)
    hw = x.shape[-1]

    # Global average pool over spatial: lane reduce (XLU), f32 accumulate.
    m = jnp.sum(x, axis=-1, keepdims=True, dtype=jnp.float32) * (1.0 / hw)  # (GB, C, 1)

    # conv_reduce (1x1, bias) + ReLU as VPU broadcast-mul + sublane reduce.
    #   h[b, r] = relu( sum_c W1[r, c] * m[b, c] + b1[r] )
    # w1_ref: (1, C, Cr) == W1^T broadcast over batch (f32).
    h = jnp.sum(m * w1_ref[...], axis=1, keepdims=True) + b1_ref[...]       # (GB, 1, Cr)
    h = jnp.maximum(h, 0.0)

    # conv_expand (1x1, bias) as VPU broadcast-mul + lane reduce.
    #   g[b, c] = sum_r W2[c, r] * h[b, r] + b2[c]
    # w2_ref: (1, C, Cr) == W2 broadcast over batch (f32).
    g = jnp.sum(h * w2_ref[...], axis=-1, keepdims=True) + b2_ref[...]      # (GB, C, 1)
    g = jax.nn.sigmoid(g)

    # Gate broadcast over the lane (HW) axis; single VPU mul per vreg, output
    # stays in the native dtype (no extra temporaries / full-block converts).
    o_ref[...] = (x * g.astype(x.dtype)).astype(o_ref.dtype)


def squeeze_excite(x_nchw, w1, b1, w2, b2):
    """x_nchw: (B, C, H, W).  w1: (Cr, C), b1: (Cr,), w2: (C, Cr), b2: (C,)."""
    B, C, H, W = x_nchw.shape
    Cr = w1.shape[0]
    HW = H * W

    # Free layout change: NCHW -> (B, C, HW) is a pure reshape (no transpose),
    # and the dtype is left untouched (bf16 stays bf16 -> half the HBM bytes).
    x = x_nchw.reshape(B, C, HW)
    itemsize = jnp.dtype(x.dtype).itemsize

    # Weights arranged so the kernel only needs broadcasts + reduces; kept in
    # f32 (tiny, resident in VMEM across all grid steps).
    w1b = jnp.asarray(w1, jnp.float32).T.reshape(1, C, Cr)   # W1^T
    b1b = jnp.asarray(b1, jnp.float32).reshape(1, 1, Cr)
    w2b = jnp.asarray(w2, jnp.float32).reshape(1, C, Cr)     # W2
    b2b = jnp.asarray(b2, jnp.float32).reshape(1, C, 1)

    # --- batch-group (gb) selection --------------------------------------
    # (a) one x block within a ~4 MiB budget (measured roofline plateau),
    # (b) >= min(B, 4) grid steps so DMA-in / compute / DMA-out pipeline and
    #     the "parallel" axis can shard across v7x's two TensorCores,
    # (c) gb divides B -> no partial last block computing on junk rows.
    bytes_per_batch = C * HW * itemsize
    max_block_bytes = 4 * 1024 * 1024                       # sweep 4-8 MiB
    gb_budget = max(1, max_block_bytes // max(bytes_per_batch, 1))
    target_steps = min(B, 4)
    gb_cap = max(1, B // target_steps)
    gb = max(1, min(B, gb_budget, gb_cap))
    while B % gb != 0:                                       # divisor of B
        gb -= 1
    num_groups = B // gb

    # --- VMEM sizing (in + out each double-buffered even with aliasing) ---
    block_bytes = gb * C * HW * itemsize
    weight_bytes = (2 * C * Cr + Cr + C) * 4
    vmem_need = 4 * block_bytes + 4 * weight_bytes + (2 << 20)   # + headroom
    vmem_limit = int(min(48 * 1024 * 1024, max(32 * 1024 * 1024, vmem_need)))
    # TODO(synk): if 4*block_bytes > ~48 MiB even at gb=1, this shape needs
    # the HW-streaming variant (especially on v7x's 64 MiB VMEM per TC).

    out = pl.pallas_call(
        _se_kernel,
        out_shape=jax.ShapeDtypeStruct((B, C, HW), x.dtype),
        grid_spec=pltpu.PrefetchScalarGridSpec(
            num_scalar_prefetch=0,
            grid=(num_groups,),
            in_specs=[
                pl.BlockSpec((gb, C, HW), lambda g: (g, 0, 0)),   # x (lane-dense)
                pl.BlockSpec((1, C, Cr), lambda g: (0, 0, 0)),    # W1^T
                pl.BlockSpec((1, 1, Cr), lambda g: (0, 0, 0)),    # b1
                pl.BlockSpec((1, C, Cr), lambda g: (0, 0, 0)),    # W2
                pl.BlockSpec((1, C, 1), lambda g: (0, 0, 0)),     # b2
            ],
            out_specs=pl.BlockSpec((gb, C, HW), lambda g: (g, 0, 0)),
        ),
        input_output_aliases={0: 0},   # pays off only if the caller donates x
        compiler_params=pltpu.CompilerParams(
            dimension_semantics=("parallel",),
            vmem_limit_bytes=vmem_limit),
    )(x, w1b, b1b, w2b, b2b)

    # Free reshape back to NCHW.
    return out.reshape(B, C, H, W)


# Donate x so input_output_aliases actually removes the extra HBM allocation
# (otherwise XLA inserts a defensive copy and the alias buys nothing).
squeeze_excite_donated = jax.jit(squeeze_excite, donate_argnums=(0,))


def reference_se(x_nchw, w1, b1, w2, b2):
    # Pure-JAX reference matching the PyTorch semantics (NCHW, 1x1 convs).
    x_se = jnp.mean(x_nchw, axis=(2, 3), keepdims=True)          # (B,C,1,1)
    x_se = jnp.einsum('bcij,oc->boij', x_se, w1) + b1[None, :, None, None]
    x_se = jnp.maximum(x_se, 0.0)
    x_se = jnp.einsum('bcij,oc->boij', x_se, w2) + b2[None, :, None, None]
    return x_nchw * jax.nn.sigmoid(x_se)


if __name__ == "__main__":
    # Module config (synthetic, deterministic params).
    in_chs = 8
    se_ratio = 0.25
    divisor = 1
    reduced_chs = make_divisible(in_chs * se_ratio, divisor)     # = 2

    B, H, W = 2, 16, 16

    key = jax.random.PRNGKey(0)
    kx, k1, kb1, k2, kb2 = jax.random.split(key, 5)
    x = jax.random.normal(kx, (B, in_chs, H, W), dtype=jnp.float32)

    # conv_reduce: Conv2d(in_chs, reduced_chs, 1, bias=True) -> weight (Cr, C)
    w1 = jax.random.normal(k1, (reduced_chs, in_chs), dtype=jnp.float32) * 0.1
    b1 = jax.random.normal(kb1, (reduced_chs,), dtype=jnp.float32) * 0.1
    # conv_expand: Conv2d(reduced_chs, in_chs, 1, bias=True) -> weight (C, Cr)
    w2 = jax.random.normal(k2, (in_chs, reduced_chs), dtype=jnp.float32) * 0.1
    b2 = jax.random.normal(kb2, (in_chs,), dtype=jnp.float32) * 0.1

    # Reference first (x is donated to the kernel call below).
    ref = jax.block_until_ready(reference_se(x, w1, b1, w2, b2))

    out = squeeze_excite_donated(x, w1, b1, w2, b2)
    out = jax.block_until_ready(out)

    assert out.shape == (B, in_chs, H, W)
    assert out.dtype == ref.dtype
    assert jnp.allclose(out, ref, atol=1e-5, rtol=1e-5), "mismatch vs reference"

    print("KERNEL_OK")
</pallas_src>

<mosaic_0001>
module attributes {stable_mosaic.version = 11 : i64} {
  func.func @_se_kernel(%arg0: i32, %arg1: memref<1x8x256xf32, #tpu.memory_space<vmem>>, %arg2: memref<1x8x2xf32, #tpu.memory_space<vmem>>, %arg3: memref<1x1x2xf32, #tpu.memory_space<vmem>>, %arg4: memref<1x8x2xf32, #tpu.memory_space<vmem>>, %arg5: memref<1x8x1xf32, #tpu.memory_space<vmem>>, %arg6: memref<1x8x256xf32, #tpu.memory_space<vmem>>) attributes {dimension_semantics = [#tpu.dimension_semantics<parallel>], iteration_bounds = array<i64: 2>, scalar_prefetch = 0 : i64, scratch_operands = 0 : i64, tpu.core_type = #tpu.core_type<tc>, window_params = [{transform_indices = @transform_0, window_bounds = array<i64: 1, 8, 256>}, {pipeline_mode = #tpu.pipeline_mode<synchronous>, transform_indices = @transform_1, window_bounds = array<i64: 1, 8, 2>}, {pipeline_mode = #tpu.pipeline_mode<synchronous>, transform_indices = @transform_2, window_bounds = array<i64: 1, 1, 2>}, {pipeline_mode = #tpu.pipeline_mode<synchronous>, transform_indices = @transform_3, window_bounds = array<i64: 1, 8, 2>}, {pipeline_mode = #tpu.pipeline_mode<synchronous>, transform_indices = @transform_4, window_bounds = array<i64: 1, 8, 1>}, {transform_indices = @transform_5, window_bounds = array<i64: 1, 8, 256>}]} {
    %c0 = arith.constant 0 : index
    %c0_0 = arith.constant 0 : index
    %c0_1 = arith.constant 0 : index
    %0 = vector.load %arg1[%c0, %c0_0, %c0_1] : memref<1x8x256xf32, #tpu.memory_space<vmem>>, vector<1x8x256xf32>
    %cst = arith.constant dense<0.000000e+00> : vector<1x8xf32>
    %1 = vector.multi_reduction <add>, %0, %cst [2] : vector<1x8x256xf32> to vector<1x8xf32>
    %2 = vector.shape_cast %1 : vector<1x8xf32> to vector<1x8x1xf32>
    %cst_2 = arith.constant 3.906250e-03 : f32
    %3 = vector.broadcast %cst_2 : f32 to vector<1x8x1xf32>
    %4 = arith.mulf %2, %3 : vector<1x8x1xf32>
    %c0_3 = arith.constant 0 : index
    %c0_4 = arith.constant 0 : index
    %c0_5 = arith.constant 0 : index
    %5 = vector.load %arg2[%c0_3, %c0_4, %c0_5] : memref<1x8x2xf32, #tpu.memory_space<vmem>>, vector<1x8x2xf32>
    %6 = vector.broadcast %4 : vector<1x8x1xf32> to vector<1x8x2xf32>
    %7 = arith.mulf %6, %5 : vector<1x8x2xf32>
    %cst_6 = arith.constant dense<0.000000e+00> : vector<1x2xf32>
    %8 = vector.multi_reduction <add>, %7, %cst_6 [1] : vector<1x8x2xf32> to vector<1x2xf32>
    %9 = vector.shape_cast %8 : vector<1x2xf32> to vector<1x1x2xf32>
    %c0_7 = arith.constant 0 : index
    %c0_8 = arith.constant 0 : index
    %c0_9 = arith.constant 0 : index
    %10 = vector.load %arg3[%c0_7, %c0_8, %c0_9] : memref<1x1x2xf32, #tpu.memory_space<vmem>>, vector<1x1x2xf32>
    %11 = arith.addf %9, %10 : vector<1x1x2xf32>
    %cst_10 = arith.constant 0.000000e+00 : f32
    %12 = vector.broadcast %cst_10 : f32 to vector<1x1x2xf32>
    %13 = arith.maximumf %11, %12 : vector<1x1x2xf32>
    %c0_11 = arith.constant 0 : index
    %c0_12 = arith.constant 0 : index
    %c0_13 = arith.constant 0 : index
    %14 = vector.load %arg4[%c0_11, %c0_12, %c0_13] : memref<1x8x2xf32, #tpu.memory_space<vmem>>, vector<1x8x2xf32>
    %15 = vector.broadcast %13 : vector<1x1x2xf32> to vector<1x8x2xf32>
    %16 = arith.mulf %15, %14 : vector<1x8x2xf32>
    %cst_14 = arith.constant dense<0.000000e+00> : vector<1x8xf32>
    %17 = vector.multi_reduction <add>, %16, %cst_14 [2] : vector<1x8x2xf32> to vector<1x8xf32>
    %18 = vector.shape_cast %17 : vector<1x8xf32> to vector<1x8x1xf32>
    %c0_15 = arith.constant 0 : index
    %c0_16 = arith.constant 0 : index
    %c0_17 = arith.constant 0 : index
    %19 = vector.load %arg5[%c0_15, %c0_16, %c0_17] : memref<1x8x1xf32, #tpu.memory_space<vmem>>, vector<1x8x1xf32>
    %20 = arith.addf %18, %19 : vector<1x8x1xf32>
    %21 = arith.negf %20 : vector<1x8x1xf32>
    %22 = math.exp %21 : vector<1x8x1xf32>
    %cst_18 = arith.constant 1.000000e+00 : f32
    %23 = vector.broadcast %cst_18 : f32 to vector<1x8x1xf32>
    %24 = arith.addf %23, %22 : vector<1x8x1xf32>
    %25 = arith.divf %23, %24 : vector<1x8x1xf32>
    %26 = vector.broadcast %25 : vector<1x8x1xf32> to vector<1x8x256xf32>
    %27 = arith.mulf %0, %26 : vector<1x8x256xf32>
    %c0_19 = arith.constant 0 : index
    %c0_20 = arith.constant 0 : index
    %c0_21 = arith.constant 0 : index
    %28 = vector.load %arg6[%c0_19, %c0_20, %c0_21] : memref<1x8x256xf32, #tpu.memory_space<vmem>>, vector<1x8x256xf32>
    tpu.vector_store %arg6[%c0_19, %c0_20, %c0_21], %27 {strides = array<i32>} : memref<1x8x256xf32, #tpu.memory_space<vmem>>, vector<1x8x256xf32>,
    return
  }
  func.func @transform_0(%arg0: i32) -> (i32, i32, i32) {
    %c0_i32 = arith.constant 0 : i32
    %c0_i32_0 = arith.constant 0 : i32
    %c0_i32_1 = arith.constant 0 : i32
    return %arg0, %c0_i32, %c0_i32_0 : i32, i32, i32
  }
  func.func @transform_1(%arg0: i32) -> (i32, i32, i32) {
    %c0_i32 = arith.constant 0 : i32
    %c0_i32_0 = arith.constant 0 : i32
    %c0_i32_1 = arith.constant 0 : i32
    %c0_i32_2 = arith.constant 0 : i32
    return %c0_i32, %c0_i32_0, %c0_i32_1 : i32, i32, i32
  }
  func.func @transform_2(%arg0: i32) -> (i32, i32, i32) {
    %c0_i32 = arith.constant 0 : i32
    %c0_i32_0 = arith.constant 0 : i32
    %c0_i32_1 = arith.constant 0 : i32
    %c0_i32_2 = arith.constant 0 : i32
    return %c0_i32, %c0_i32_0, %c0_i32_1 : i32, i32, i32
  }
  func.func @transform_3(%arg0: i32) -> (i32, i32, i32) {
    %c0_i32 = arith.constant 0 : i32
    %c0_i32_0 = arith.constant 0 : i32
    %c0_i32_1 = arith.constant 0 : i32
    %c0_i32_2 = arith.constant 0 : i32
    return %c0_i32, %c0_i32_0, %c0_i32_1 : i32, i32, i32
  }
  func.func @transform_4(%arg0: i32) -> (i32, i32, i32) {
    %c0_i32 = arith.constant 0 : i32
    %c0_i32_0 = arith.constant 0 : i32
    %c0_i32_1 = arith.constant 0 : i32
    %c0_i32_2 = arith.constant 0 : i32
    return %c0_i32, %c0_i32_0, %c0_i32_1 : i32, i32, i32
  }
  func.func @transform_5(%arg0: i32) -> (i32, i32, i32) {
    %c0_i32 = arith.constant 0 : i32
    %c0_i32_0 = arith.constant 0 : i32
    %c0_i32_1 = arith.constant 0 : i32
    return %arg0, %c0_i32, %c0_i32_0 : i32, i32, i32
  }
}

</mosaic_0001>

<bundles_post_ra>
// kernel: squeeze_excite.1
= control target key start
LH: loop header
LB: loop body
LE: loop exit
PB: predicated region body
PF: predicated region fallthrough
CT: control target
= control target key end

     0   :  { %s393_s18 = smov 0   ;;  %s431_s0 = inlined_call_operand.vmem [shape: f32[2,8,256], index: 0, kind: input, shape index: {}, may-alias: {0,5}]   ;;  %s432_s1 = inlined_call_operand.vmem [shape: f32[1,8,2], index: 1, kind: input, shape index: {}]   ;;  %s433_s2 = inlined_call_operand.vmem [shape: f32[1,1,2], index: 2, kind: input, shape index: {}]   ;;  %s434_s3 = inlined_call_operand.vmem [shape: f32[1,8,2], index: 3, kind: input, shape index: {}]   ;;  %s435_s4 = inlined_call_operand.vmem [shape: f32[1,8,1], index: 4, kind: input, shape index: {}]   ;;  %s436_s5 = inlined_call_operand.vmem [shape: f32[2,8,256], index: 5, kind: output, shape index: {}, may-alias: {0,5}]  }
   0x1 LB: > { %s325_s19 = sadd.s32 4294967295, %s360_s18   ;;  %p329_p0 = scmp.ge.s32.totalorder %s360_s18, 1  ;;  %s360_s18 = sphi %s393_s18, %s15_s18  }
   0x2   : > { %p187_p1 = scmp.lt.s32.totalorder %s360_s18, 3 }
   0x4   : > { %p188_p2 = pnand %p329_p0, %p187_p1 }
   0x5   : > { %p215_p3 = scmp.lt.s32.totalorder (!%p188_p2), %s325_s19, 1  ;;  %v231_v3 = vld [vmem:[%s432_s1] sm:$0xff] (!%p188_p2)  ;;  %vm233_vm0 = vcmask (!%p188_p2), 15360   ;;  %v245_v11 = vlaneseq (!%p188_p2)  ;;  %v362_v24 = vmov (!%p188_p2), 0  }
   0x6   : > { %191 = sbr.rel (%p188_p2) target bundleno = 488 (0x1e8), region = 40  ;;  %v241_v15 = vld [vmem:[%s433_s2] sm:$0x1] (!%p188_p2)  ;;  %348 = vset.pattern.permute.xlu1 (!%p188_p2), %v362_v24  ;;  %349 = vset.pattern.permute.xlu0 (!%p188_p2), %v362_v24 }
   0x7   : > { %v246_v14 = vshrl.u32 (!%p188_p2), %v245_v11, 7  ;;  %v244_v20 = vld [vmem:[%s434_s3] sm:$0xff] (!%p188_p2) }
   0x8   : > { %v253_v25 = vld [vmem:[%s435_s4] sm:$0xff] (!%p188_p2) }
   0x9   : > { %v247_v18 = vsub.s32 (!%p188_p2), 0, %v246_v14 }
   0xd   : > { %s438_s19 = smov (!%p215_p3, %s325_s19), 1 }
   0xe   : > { %s337_s20 = sshll.u32 %s438_s19, 4 }
   0xf   : > { %s219_s23 = scalar_lea.vmem %s431_s0, %s337_s20  ;;  %s224_s9 = scalar_lea.vmem %s436_s5, %s337_s20 }
  0x10   : > { %v225_v0 = vld [vmem:[%s219_s23] sm:$0xff]  ;;  %v226_v1 = vld [vmem:[%s219_s23 + $0x8] sm:$0xff] }
  0x11   : > { %v227_v2 = vadd.f32 %v226_v1, %v225_v0 }
  0x13   : > { %228 = vadd.xlane.f32.xlu0 %v227_v2 }
  0xa0   : > { %v229_v4 = vpop.xlane.xlu0 %228 }
  0xa1   : > { %v230_v5 = vmul.f32 0.00390625, %v229_v4 }
  0xa3   : > { %v232_v6 = vmul.f32 %v231_v3, %v230_v5 }
  0xa5   : > { %v234_v7 = vsel %vm233_vm0, %v232_v6, 0.0 }
  0xa6   : > { %v235_v8 = vrot.slane %v234_v7, 4 }
  0xa8   : > { %v236_v9 = vadd.f32 %v235_v8, %v234_v7 }
  0xaa   : > { %v237_v10 = vrot.slane %v236_v9, 2 }
  0xac   : > { %v238_v12 = vadd.f32 %v237_v10, %v236_v9 }
  0xae   : > { %v239_v13 = vrot.slane %v238_v12, 1 }
  0xb0   : > { %v240_v16 = vadd.f32 %v239_v13, %v238_v12 }
  0xb2   : > { %v242_v17 = vadd.f32 %v241_v15, %v240_v16 }
  0xb4   : > { %v243_v19 = vmax.f32 %v242_v17, 0.0 }
  0xb6   : > { %v248_v21 = vrot.slane %v243_v19, %v247_v18 }
  0xb8   : > { %v249_v22 = vmul.f32 %v248_v21, %v244_v20 }
  0xba   : > { %v250_v23 = vsel %vm233_vm0, %v249_v22, 0.0 }
  0xbb   : > { %251 = vadd.xlane.f32.xlu0 %v250_v23 }
 0x148   : > { %v252_v26 = vpop.xlane.xlu0 %251 }
 0x149   : > { %v254_v27 = vadd.f32 %v253_v25, %v252_v26 }
 0x14b   : > { %v334_v28 = vmul.f32 -1.442695, %v254_v27 }
 0x14d   : > { %350 = vpow2.f32 %v334_v28 }
 0x157   : > { %v351_v29 = vpop.eup %350 }
 0x158   : > { %v258_v30 = vadd.f32 1.0, %v351_v29 }
 0x15a   : > { %352 = vrcp.f32 %v258_v30 }
 0x164   : > { %v353_v31 = vpop.eup %352 }
 0x165   : > { %263 = vperm.xlu1 %348, %v353_v31  }
 0x1e4   : > { %v264_v32 = vpop.permute.xlu1 %263 }
 0x1e5   : > { %v266_v33 = vmul.f32 %v264_v32, %v225_v0  ;;  %v267_v34 = vmul.f32 %v264_v32, %v226_v1 }
 0x1e7   : > { %268 = vst [vmem:[%s224_s9] sm:$0xff] %v266_v33  ;;  %269 = vst [vmem:[%s224_s9 + $0x8] sm:$0xff] %v267_v34 }
 0x1e8 PF: > { %s15_s18 = sadd.s32 1, %s360_s18  }
 0x1e9   : > { %p12_p4 = scmp.ge.s32.totalorder %s15_s18, 4  }
 0x1eb   :  { %14 = sbr.rel (!%p12_p4) target bundleno = 1 (0x1), region = 70 }

</bundles_post_ra>
